<compile_context>
chip_gen: v7x
topology: tpu7x:2x2x1
jax: 0.10.0
libtpu: 0.0.40
codegen_flags: <defaults>
</compile_context>

<pallas_src>
import jax
import jax.numpy as jnp
from jax.experimental import pallas as pl
from jax.experimental.pallas import tpu as pltpu

# ---- scaled-down module hyper-parameters (structurally identical) ----
N = 2           # batch
C_IN = 64       # torch: 1024
H_IN = 8        # torch: 8
W_IN = 10       # torch: 10
K = C_IN * H_IN * W_IN   # flattened features = 5120 (torch: 81920)
HID = 256       # torch: 512
OH, OW = 24, 32          # torch: (120, 160)

TH = 128        # HID column tile ("parallel" axis; multiple of 128)
TK = 2560       # K reduction tile ("arbitrary" axis; multiple of 128)


def fc_relu_kernel(x_ref, wfc_ref, bfc_ref, h_ref):
    # x_ref:   (N, K)    bf16, resident (constant index_map), sliced in-kernel
    # wfc_ref: (TK, TH)  bf16, streamed over the K ("arbitrary") axis
    # bfc_ref: (1, TH)   f32, one tile per HID column block
    # h_ref:   (N, TH)   f32 output block, resident across the K axis and used
    #                    directly as the accumulator (no extra VMEM scratch).
    k = pl.program_id(1)
    start = pl.multiple_of(k * TK, TK)
    partial = jnp.dot(
        x_ref[:, pl.ds(start, TK)], wfc_ref[...],
        preferred_element_type=jnp.float32,
    )

    @pl.when(k == 0)
    def _():
        h_ref[...] = partial

    @pl.when(k > 0)
    def _():
        h_ref[...] += partial

    @pl.when(k == pl.num_programs(1) - 1)
    def _():
        # global_fc bias + ReLU, applied in place on the resident output block.
        h_ref[...] = jnp.maximum(h_ref[...] + bfc_ref[...], 0.0)


def conv1x1_kernel(h_ref, wconv_ref, bconv_ref, y_ref):
    # 1x1 conv on a 1x1 spatial map == one dense layer on the full h vector.
    y_ref[...] = (
        jnp.dot(h_ref[...], wconv_ref[...], preferred_element_type=jnp.float32)
        + bconv_ref[...]
    ).astype(y_ref.dtype)


def full_image_encoder(x_nchw, w_fc, b_fc, w_conv, b_conv):
    n = x_nchw.shape[0]
    assert K % TK == 0 and HID % TH == 0, "tile sizes must divide K / HID"

    # Dropout2d in eval mode is the identity; flatten exactly like
    # x.view(-1, C*H*W).  Stream activations as bf16 (f32 accumulate below).
    x_flat = x_nchw.reshape(n, K).astype(jnp.bfloat16)

    # Stage 1: h = relu(x @ w_fc + b_fc), HID split across a parallel axis so
    # both v7x TensorCores stream disjoint column blocks of w_fc.
    h = pl.pallas_call(
        fc_relu_kernel,
        out_shape=jax.ShapeDtypeStruct((n, HID), jnp.float32),
        grid_spec=pltpu.PrefetchScalarGridSpec(
            num_scalar_prefetch=0,
            grid=(HID // TH, K // TK),
            in_specs=[
                # x: full array, constant index_map -> fetched once, resident.
                # TODO(synk): pipeline_mode=pl.Buffered(1) here would skip the
                # useless second buffer; left at default for compile safety.
                pl.BlockSpec((n, K), lambda h, k: (0, 0)),
                # w_fc: streamed (TK, TH) tiles — the dominant HBM traffic.
                pl.BlockSpec((TK, TH), lambda h, k: (k, h)),
                # b_fc: one tiny tile per column block.
                pl.BlockSpec((1, TH), lambda h, k: (0, h)),
            ],
            out_specs=pl.BlockSpec((n, TH), lambda h, k: (0, h)),
        ),
        compiler_params=pltpu.CompilerParams(
            # HID blocks are independent; K is the reduction -> last + arbitrary.
            dimension_semantics=("parallel", "arbitrary"),
            # NOTE: at real DORN size set vmem_limit_bytes per generation
            # (see header comment); defaults are plenty at this toy size.
        ),
    )(x_flat, w_fc, b_fc)

    # Stage 2: y = h @ w_conv + b_conv (needs the full h vector, so it lives in
    # its own trivial single-block pallas_call).
    y = pl.pallas_call(
        conv1x1_kernel,
        out_shape=jax.ShapeDtypeStruct((n, HID), jnp.float32),
    )(h, w_conv, b_conv)

    # nn.Upsample(size=(OH, OW), mode='nearest') from a 1x1 map is a pure
    # broadcast — never materialized inside the kernels.
    return jnp.broadcast_to(y[:, :, None, None], (n, HID, OH, OW))


def make_params(key):
    # init_weights semantics (the `type` check falls through to the default):
    #   Linear:  weight.fill_(1.0), bias.zero_()
    #   Conv2d:  weight ~ Normal(0, sqrt(2 / (kh*kw*out_channels))), bias.zero_()
    # torch Linear weight is (HID, K); we store its transpose (K, HID) in bf16.
    w_fc = jnp.ones((K, HID), dtype=jnp.bfloat16)
    b_fc = jnp.zeros((1, HID), dtype=jnp.float32)

    # torch conv weight (out, in, 1, 1); output[o] = sum_i w[o,i]*in[i]
    # -> right-multiply form W[i, o] = w[o, i]
    std = (2.0 / (1 * 1 * HID)) ** 0.5
    w_conv_oi = std * jax.random.normal(key, (HID, HID), dtype=jnp.float32)
    w_conv = w_conv_oi.T
    b_conv = jnp.zeros((1, HID), dtype=jnp.float32)
    return w_fc, b_fc, w_conv, b_conv


def reference(x_nchw, w_fc, b_fc, w_conv, b_conv):
    # Pure-JAX reference of the PyTorch forward (eval mode, dropout identity),
    # using the same bf16 storage / f32 accumulation as the kernels.
    n = x_nchw.shape[0]
    x_flat = x_nchw.reshape(n, K).astype(jnp.bfloat16)
    h = jnp.maximum(
        jnp.dot(x_flat, w_fc, preferred_element_type=jnp.float32) + b_fc, 0.0)
    y = jnp.dot(h, w_conv, preferred_element_type=jnp.float32) + b_conv
    return jnp.broadcast_to(y[:, :, None, None], (n, HID, OH, OW))


if __name__ == "__main__":
    key = jax.random.PRNGKey(0)
    k_x, k_w = jax.random.split(key)

    x = jax.random.normal(k_x, (N, C_IN, H_IN, W_IN), dtype=jnp.float32)
    w_fc, b_fc, w_conv, b_conv = make_params(k_w)

    # TODO(synk): Dropout2d(p=0.5) is only active in training; eval-mode
    # identity is used here.
    out = full_image_encoder(x, w_fc, b_fc, w_conv, b_conv)
    out = jax.block_until_ready(out)

    ref = reference(x, w_fc, b_fc, w_conv, b_conv)
    assert out.shape == (N, HID, OH, OW)
    assert jnp.allclose(out, ref, rtol=1e-3, atol=1e-2)

    print("KERNEL_OK")
</pallas_src>

<mosaic_0001>
module attributes {stable_mosaic.version = 11 : i64} {
  func.func @fc_relu_kernel(%arg0: i32, %arg1: i32, %arg2: memref<2x5120xbf16, #tpu.memory_space<vmem>>, %arg3: memref<2560x128xbf16, #tpu.memory_space<vmem>>, %arg4: memref<1x128xf32, #tpu.memory_space<vmem>>, %arg5: memref<2x128xf32, #tpu.memory_space<vmem>>) attributes {dimension_semantics = [#tpu.dimension_semantics<parallel>, #tpu.dimension_semantics<arbitrary>], iteration_bounds = array<i64: 2, 2>, scalar_prefetch = 0 : i64, scratch_operands = 0 : i64, tpu.core_type = #tpu.core_type<tc>, window_params = [{pipeline_mode = #tpu.pipeline_mode<synchronous>, transform_indices = @transform_0, window_bounds = array<i64: 2, 5120>}, {transform_indices = @transform_1, window_bounds = array<i64: 2560, 128>}, {transform_indices = @transform_2, window_bounds = array<i64: 1, 128>}, {transform_indices = @transform_3, window_bounds = array<i64: 2, 128>}]} {
    %c2560_i32 = arith.constant 2560 : i32
    %0 = arith.muli %arg1, %c2560_i32 : i32
    %1 = tpu.assume_multiple %0, 2560 : i32
    %c0 = arith.constant 0 : index
    %2 = arith.index_cast %1 : i32 to index
    %3 = vector.load %arg2[%c0, %2] : memref<2x5120xbf16, #tpu.memory_space<vmem>>, vector<2x2560xbf16>
    %c0_0 = arith.constant 0 : index
    %c0_1 = arith.constant 0 : index
    %4 = vector.load %arg3[%c0_0, %c0_1] : memref<2560x128xbf16, #tpu.memory_space<vmem>>, vector<2560x128xbf16>
    %cst = arith.constant dense<0.000000e+00> : vector<2x128xf32>
    %5 = tpu.matmul %3, %4, %cst {dimension_numbers = #tpu.dot_dimension_numbers<[1], [0], [0], [1], [0, 0, 1, 1], [], []>} : vector<2x2560xbf16>, vector<2560x128xbf16>, vector<2x128xf32> -> vector<2x128xf32>
    %c0_i32 = arith.constant 0 : i32
    %6 = arith.cmpi eq, %arg1, %c0_i32 : i32
    %7 = arith.extui %6 : i1 to i32
    %c0_i32_2 = arith.constant 0 : i32
    %8 = arith.cmpi ne, %7, %c0_i32_2 : i32
    scf.if %8 {
      %c0_6 = arith.constant 0 : index
      %c0_7 = arith.constant 0 : index
      %15 = vector.load %arg5[%c0_6, %c0_7] : memref<2x128xf32, #tpu.memory_space<vmem>>, vector<2x128xf32>
      tpu.vector_store %arg5[%c0_6, %c0_7], %5 {strides = array<i32>} : memref<2x128xf32, #tpu.memory_space<vmem>>, vector<2x128xf32>,
    } else {
    }
    %c0_i32_3 = arith.constant 0 : i32
    %9 = arith.cmpi sgt, %arg1, %c0_i32_3 : i32
    %10 = arith.extui %9 : i1 to i32
    %c0_i32_4 = arith.constant 0 : i32
    %11 = arith.cmpi ne, %10, %c0_i32_4 : i32
    scf.if %11 {
      %c0_6 = arith.constant 0 : index
      %c0_7 = arith.constant 0 : index
      %15 = vector.load %arg5[%c0_6, %c0_7] : memref<2x128xf32, #tpu.memory_space<vmem>>, vector<2x128xf32>
      %16 = arith.addf %15, %5 : vector<2x128xf32>
      %c0_8 = arith.constant 0 : index
      %c0_9 = arith.constant 0 : index
      %17 = vector.load %arg5[%c0_8, %c0_9] : memref<2x128xf32, #tpu.memory_space<vmem>>, vector<2x128xf32>
      tpu.vector_store %arg5[%c0_8, %c0_9], %16 {strides = array<i32>} : memref<2x128xf32, #tpu.memory_space<vmem>>, vector<2x128xf32>,
    } else {
    }
    %c1_i32 = arith.constant 1 : i32
    %12 = arith.cmpi eq, %arg1, %c1_i32 : i32
    %13 = arith.extui %12 : i1 to i32
    %c0_i32_5 = arith.constant 0 : i32
    %14 = arith.cmpi ne, %13, %c0_i32_5 : i32
    scf.if %14 {
      %c0_6 = arith.constant 0 : index
      %c0_7 = arith.constant 0 : index
      %15 = vector.load %arg5[%c0_6, %c0_7] : memref<2x128xf32, #tpu.memory_space<vmem>>, vector<2x128xf32>
      %c0_8 = arith.constant 0 : index
      %c0_9 = arith.constant 0 : index
      %16 = vector.load %arg4[%c0_8, %c0_9] : memref<1x128xf32, #tpu.memory_space<vmem>>, vector<1x128xf32>
      %17 = vector.broadcast %16 : vector<1x128xf32> to vector<2x128xf32>
      %18 = arith.addf %15, %17 : vector<2x128xf32>
      %cst_10 = arith.constant 0.000000e+00 : f32
      %19 = vector.broadcast %cst_10 : f32 to vector<2x128xf32>
      %20 = arith.maximumf %18, %19 : vector<2x128xf32>
      %c0_11 = arith.constant 0 : index
      %c0_12 = arith.constant 0 : index
      %21 = vector.load %arg5[%c0_11, %c0_12] : memref<2x128xf32, #tpu.memory_space<vmem>>, vector<2x128xf32>
      tpu.vector_store %arg5[%c0_11, %c0_12], %20 {strides = array<i32>} : memref<2x128xf32, #tpu.memory_space<vmem>>, vector<2x128xf32>,
    } else {
    }
    return
  }
  func.func @transform_0(%arg0: i32, %arg1: i32) -> (i32, i32) {
    %c0_i32 = arith.constant 0 : i32
    %c0_i32_0 = arith.constant 0 : i32
    %c0_i32_1 = arith.constant 0 : i32
    return %c0_i32, %c0_i32_0 : i32, i32
  }
  func.func @transform_1(%arg0: i32, %arg1: i32) -> (i32, i32) {
    %c0_i32 = arith.constant 0 : i32
    return %arg1, %arg0 : i32, i32
  }
  func.func @transform_2(%arg0: i32, %arg1: i32) -> (i32, i32) {
    %c0_i32 = arith.constant 0 : i32
    %c0_i32_0 = arith.constant 0 : i32
    return %c0_i32, %arg0 : i32, i32
  }
  func.func @transform_3(%arg0: i32, %arg1: i32) -> (i32, i32) {
    %c0_i32 = arith.constant 0 : i32
    %c0_i32_0 = arith.constant 0 : i32
    return %c0_i32, %arg0 : i32, i32
  }
}

</mosaic_0001>

<bundles_post_ra>
// kernel: tpu_custom_call.1
= control target key start
LH: loop header
LB: loop body
LE: loop exit
PB: predicated region body
PF: predicated region fallthrough
CT: control target
= control target key end

     0   :  { %s3709_s0 = inlined_call_operand.hbm [shape: bf16[2,5120], index: 0, kind: input, shape index: {}]   ;;  %s3710_s1 = inlined_call_operand.hbm [shape: bf16[5120,256], index: 1, kind: input, shape index: {}]   ;;  %s3711_s2 = inlined_call_operand.hbm [shape: f32[1,256], index: 2, kind: input, shape index: {}]   ;;  %s3712_s3 = inlined_call_operand.hbm [shape: f32[2,256], index: 3, kind: output, shape index: {}]  }
   0x1   :  { %3721 = sst [smem:[#allocation15_spill]] %s3710_s1 }
   0x2   :  { %3722 = sst [smem:[#allocation16_spill]] %s3712_s3 }
   0x3   :  { %8 = vsyncpa [#allocation3], 0 }
   0x4   :  { %9 = vsyncpa [#allocation6], 0 }
   0x5   :  { %11 = vsyncpa [#allocation6 + $0x1], 0 }
   0x6   :  { %12 = vsyncpa [#allocation4], 0 }
   0x7   :  { %14 = vsyncpa [#allocation4 + $0x1], 0  ;;  %s3172_s12 = smov 0   ;;  %s3174_s13 = smov 0  }
   0x8   :  { %s3176_s14 = smov 0   ;;  %s3178_s15 = smov 0  }
   0x9   :  { %s3180_s16 = smov 0   ;;  %s3182_s17 = smov 0  }
   0xa   :  { %s3184_s18 = smov 0   ;;  %s3186_s19 = smov 0  }
   0xb   :  { %s3188_s20 = smov 0   ;;  %s3190_s21 = smov 0  }
   0xc   :  { %s3192_s22 = smov 0  }
   0xd LB: > { %3723 = sst [smem:[#allocation13_spill]] %s3130_s19  ;;  %s29_s23 = sadd.s32 1, %s3134_s20  ;;  %s3142_s22 = sphi %s3192_s22, %s20_s22   ;;  %s3138_s21 = sphi %s3190_s21, %s3758_s21   ;;  %s3134_s20 = sphi %s3188_s20, %s3757_s20   ;;  %s3130_s19 = sphi %s3186_s19, %s3756_s19   ;;  %s3126_s18 = sphi %s3184_s18, %s3755_s18   ;;  %s3122_s17 = sphi %s3182_s17, %s3754_s17   ;;  %s3118_s16 = sphi %s3180_s16, %s3753_s16   ;;  %s3114_s15 = sphi %s3178_s15, %s3752_s15   ;;  %s3110_s14 = sphi %s3176_s14, %s3751_s14   ;;  %s3106_s13 = sphi %s3174_s13, %s3750_s13   ;;  %s3102_s12 = sphi %s3172_s12, %s3749_s12  }
   0xe   : > { %s32_s24 = sadd.s32 1, %s3138_s21  ;;  %p30_p0 = scmp.ge.s32.totalorder %s29_s23, 2 }
   0xf   : > { %s62_s25 = sadd.s32 1, %s3122_s17  ;;  %p69_p1 = scmp.ne.s32.totalorder %s3122_s17, %s3118_s16 }
  0x10   : > { %p70_p2 = scmp.eq.s32.totalorder %s3142_s22, 0  ;;  %s3760_s23 = smov (%p30_p0, %s29_s23), 0 }
  0x11   : > { %3724 = sst [smem:[#allocation14_spill]] %s3760_s23  ;;  %s3762_s24 = smov (!%p30_p0, %s32_s24), %s3138_s21 }
  0x12   : > { %s57_s26 = ssub.s32 %s3134_s20, %s3760_s23  ;;  %p3240_p3 = por %p70_p2, %p69_p1 }
  0x13   : > { %p34_p4 = scmp.ge.s32.totalorder %s3762_s24, 2  ;;  %p3715_p5 = scmp.lt.s32.totalorder %s3142_s22, 4 }
  0x14   : > { %s162_s28 = sand.u32 1, %s3142_s22   ;;  %s164_s29 = sand.u32 1, %s3122_s17  }
  0x15   : > { %s3764_s24 = smov (%p34_p4, %s3762_s24), 0  ;;  %s2638_s4 = smul.u32 1280, %s164_s29 }
  0x16   : > { %s3251_s30 = ssub.s32 %s3138_s21, %s3764_s24  ;;  %s2417_s6 = smul.u32 640, %s3134_s20 }
  0x17   : > { %s59_s5 = sor.u32 %s3251_s30, %s57_s26  ;;  %s166_s8 = scalar_lea.vmem [#allocation5], %s2638_s4 }
  0x18   : > { %p60_p6 = scmp.eq.s32.totalorder %s59_s5, 0  ;;  %s172_s7 = sadd.s32 %s3138_s21, %s2417_s6 }
  0x19   : > { %s175_s9 = sshll.u32 %s166_s8, 4  ;;  %s2243_s11 = sshll.u32 %s172_s7, 6  ;;  %s3259_s9 = int_to_ptr.vmem [resolvable:$true] %s175_s9 }
  0x1a   : > { %s3257_s10 = scalar_select %p60_p6, %s3122_s17, %s62_s25  }
  0x1b   : > { %s3726_s1 = sld [smem:[#allocation15_spill]]  ;;  %p3270_p7 = pnand %p3715_p5, %p3240_p3 }
  0x1c   : > { %s3274_s25 = scalar_lea.sflag [#allocation6], %s162_s28 }
  0x1d   : > { %p2926_p9 = pneg %p3270_p7 }
  0x21   : > { %s3264_s19 = scalar_lea.hbm %s3726_s1, %s2243_s11  ;;  %s2929_s27 = scalar_lea.hbm %s3726_s1, 81920 }
  0x22   : > { %s2924_s29 = scalar_lea.hbm %s3264_s19, 20480  ;;  %p2930_p12 = scmp.lt.u32.totalorder %s3264_s19, %s3726_s1 }
  0x23   : > { %p2925_p8 = scmp.ne.s32.totalorder %s3264_s19, %s2924_s29  ;;  %p2931_p13 = scmp.lt.u32.totalorder %s2929_s27, %s2924_s29 }
  0x24   : > { %p2933_p1 = scmp.lt.u32.totalorder %s2924_s29, %s3264_s19 }
  0x25   : > { %p2927_p10 = pnand %p2926_p9, %p2925_p8  ;;  %p2932_p0 = por %p2931_p13, %p2930_p12 }
  0x27   : > { %p2928_p11 = pneg %p2927_p10  ;;  %p2934_p3 = por %p2933_p1, %p2932_p0 }
  0x29   : > { %p2935_p4 = pnand %p2934_p3, %p2928_p11 }
  0x2b   : > { %2938 = shalt.err (!%p2935_p4)
}
  0x2c   : > { %s2939_s28 = scalar_lea.vmem %s3259_s9, 20480  ;;  %s3144_s6 = smov [#allocation5]  }
  0x2d   : > { %p2940_p6 = scmp.ne.s32.totalorder %s3259_s9, %s2939_s28  ;;  %s2944_s7 = sshll.u32 %s3144_s6, 4  ;;  %s2945_s7 = int_to_ptr.vmem [resolvable:$false] %s2944_s7 }
  0x2e   : > { %s2946_s8 = scalar_lea.vmem %s2945_s7, 40960  ;;  %p2947_p5 = scmp.lt.s32.totalorder %s3259_s9, %s2945_s7 }
  0x2f   : > { %p2942_p8 = pnand %p2940_p6, %p2926_p9  ;;  %p2948_p12 = scmp.lt.s32.totalorder %s2946_s8, %s2939_s28 }
  0x31   : > { %p2943_p10 = pneg %p2942_p8  ;;  %p2949_p13 = por %p2948_p12, %p2947_p5 }
  0x33   : > { %p2950_p0 = pnand %p2949_p13, %p2943_p10 }
  0x35   : > { %2953 = shalt.err (!%p2950_p0)
}
  0x36   : > { %s3145_s11 = smov 128   ;;  %s3146_s29 = smov 64  }
  0x37   : > { %s3147_s3 = smov 4   ;;  %s3303_s23 = sadd.s32 4294967295, %s3142_s22  }
  0x38   : > { %2657 = dma.hbm_to_vmem [thread:$0]  (!%p3270_p7), %s3264_s19, 20480, %s3259_s9, %s3274_s25, %s3145_s11, %s3146_s29, %s3147_s3  }
  0x39   : > { %s2238_s27 = sadd.s32 4294967294, %s3142_s22   ;;  %p75_p5 = scmp.ne.s32.totalorder %s3118_s16, %s3114_s15 }
  0x3a   : > { %p3716_p9 = scmp.eq.s32.totalorder %s3303_s23, 0  ;;  %p101_p11 = scmp.ne.s32.totalorder %s3106_s13, %s3102_s12 }
  0x3b   : > { %p131_p7 = scmp.eq.s32.totalorder %s2238_s27, 3  ;;  %p2239_p6 = scmp.ge.s32.totalorder %s3142_s22, 1 }
  0x3c   : > { %p3314_p3 = por %p3716_p9, %p75_p5  ;;  %p3320_p4 = por %p101_p11, %p3716_p9 }
  0x3d   : > { %p3325_p8 = por %p131_p7, %p101_p11  ;;  %p138_p10 = scmp.lt.s32.totalorder %s3142_s22, 5 }
  0x3e   : > { %s3728_s19 = scalar_select %p3314_p3, 1, 0 }
  0x3f   : > { %s3729_s15 = scalar_select %p3320_p4, 1, 0 }
  0x40   : > { %s3730_s9 = scalar_select %p3325_p8, 1, 0 }
  0x41   : > { %p3330_p12 = pnand %p2239_p6, %p138_p10  ;;  %s3148_s4 = smov [#allocation2]  }
  0x42   : > { %s151_s5 = sshll.u32 %s3148_s4, 4  ;;  %p86_p0 = scmp.eq.s32.totalorder %s3251_s30, 0  ;;  %s152_s5 = int_to_ptr.vmem [resolvable:$true] %s151_s5 }
  0x43   : > { %s3731_s26 = scalar_select %p3330_p12, 1, 0 }
  0x44   : > { %p2650_p13 = pneg %p3330_p12  ;;  %s88_s28 = sadd.s32 1, %s3110_s14 }
  0x45   : > { %p3717_p11 = scmp.ne.s32.totalorder %s3110_s14, %s3106_s13  ;;  %s2954_s30 = scalar_lea.hbm %s3709_s0, 640 }
  0x46   : > { %p3340_p5 = pnand %p2650_p13, %p3716_p9  ;;  %p2955_p6 = scmp.ne.s32.totalorder %s3709_s0, %s2954_s30 }
  0x47   : > { %s3347_s7 = scalar_select %p86_p0, %s3110_s14, %s88_s28  }
  0x48   : > { %p3354_p7 = por %p3717_p11, %p70_p2  ;;  %p2956_p10 = pneg %p3340_p5 }
  0x49   : > { %p2961_p0 = scmp.lt.u32.totalorder %s2954_s30, %s3709_s0 }
  0x4a   : > { %s3733_s8 = scalar_select %p3354_p7, 1, 0 }
  0x4b   : > { %p2957_p13 = pnand %p2956_p10, %p2955_p6 }
  0x4d   : > { %p2958_p9 = pneg %p2957_p13 }
  0x4f   : > { %p2963_p2 = pnand %p2961_p0, %p2958_p9 }
  0x51   : > { %2966 = shalt.err (!%p2963_p2)
}
  0x52   : > { %s2967_s1 = scalar_lea.vmem %s152_s5, 640  ;;  %p2975_p4 = scmp.lt.s32.totalorder %s152_s5, %s152_s5 }
  0x53   : > { %p2968_p1 = scmp.ne.s32.totalorder %s152_s5, %s2967_s1  ;;  %p2976_p3 = scmp.lt.s32.totalorder %s2967_s1, %s2967_s1 }
  0x55   : > { %p2970_p11 = pnand %p2968_p1, %p2956_p10  ;;  %p2977_p12 = por %p2976_p3, %p2975_p4 }
  0x57   : > { %p2971_p8 = pneg %p2970_p11 }
  0x59   : > { %p2978_p7 = pnand %p2977_p12, %p2971_p8 }
  0x5b   : > { %2981 = shalt.err (!%p2978_p7)
}
  0x5c   : > { %2653 = dma.hbm_to_vmem [thread:$0]  (!%p3340_p5), %s3709_s0, 640, %s152_s5, [#allocation3]  }
  0x5d   : > { %p3734_p9 = scmp.ne.s32.totalorder %s3110_s14, %s3106_s13  ;;  %p3735_p1 = scmp.eq.s32.totalorder %s3303_s23, 3 }
  0x5e   : > { %s187_s30 = sand.u32 1, %s3110_s14   ;;  %s2244_s3 = sshll.u32 %s3138_s21, 4 }
  0x5f   : > { %p3379_p11 = por %p3735_p1, %p3734_p9  ;;  %s3388_s4 = scalar_lea.hbm %s3711_s2, %s2244_s3 }
  0x60   : > { %s188_s28 = scalar_lea.vmem [#allocation7], %s187_s30  ;;  %p3737_p3 = scmp.ne.s32.totalorder %s3733_s8, 0 }
  0x61   : > { %s195_s11 = sshll.u32 %s188_s28, 4  ;;  %p3738_p4 = scmp.lt.s32.totalorder %s3142_s22, 4  ;;  %s3390_s11 = int_to_ptr.vmem [resolvable:$true] %s195_s11 }
  0x62   : > { %s2982_s29 = scalar_lea.hbm %s3388_s4, 16  ;;  %s2987_s6 = scalar_lea.hbm %s3711_s2, 32 }
  0x63   : > { %p3396_p8 = pnand %p3738_p4, %p3737_p3  ;;  %p2983_p12 = scmp.ne.s32.totalorder %s3388_s4, %s2982_s29 }
  0x64   : > { %p2988_p10 = scmp.lt.u32.totalorder %s3388_s4, %s3711_s2  ;;  %p2989_p13 = scmp.lt.u32.totalorder %s2987_s6, %s2982_s29 }
  0x65   : > { %p2984_p5 = pneg %p3396_p8  ;;  %p2991_p2 = scmp.lt.u32.totalorder %s2982_s29, %s3388_s4 }
  0x66   : > { %p2990_p0 = por %p2989_p13, %p2988_p10 }
  0x67   : > { %p2985_p7 = pnand %p2984_p5, %p2983_p12 }
  0x68   : > { %p2992_p9 = por %p2991_p2, %p2990_p0 }
  0x69   : > { %p2986_p6 = pneg %p2985_p7 }
  0x6b   : > { %p2993_p1 = pnand %p2992_p9, %p2986_p6 }
  0x6d   : > { %2996 = shalt.err (!%p2993_p1)
}
  0x6e   : > { %s2997_s28 = scalar_lea.vmem %s3390_s11, 16  ;;  %s3149_s30 = smov [#allocation7]  }
  0x6f   : > { %p2998_p3 = scmp.ne.s32.totalorder %s3390_s11, %s2997_s28  ;;  %s3002_s3 = sshll.u32 %s3149_s30, 4  ;;  %s3003_s3 = int_to_ptr.vmem [resolvable:$false] %s3002_s3 }
  0x70   : > { %s3004_s8 = scalar_lea.vmem %s3003_s3, 32  ;;  %p3005_p7 = scmp.lt.s32.totalorder %s3390_s11, %s3003_s3 }
  0x71   : > { %p3000_p4 = pnand %p2998_p3, %p2984_p5  ;;  %p3006_p10 = scmp.lt.s32.totalorder %s3004_s8, %s2997_s28 }
  0x73   : > { %p3001_p12 = pneg %p3000_p4  ;;  %p3007_p13 = por %p3006_p10, %p3005_p7 }
  0x75   : > { %p3008_p0 = pnand %p3007_p13, %p3001_p12 }
  0x77   : > { %3011 = shalt.err (!%p3008_p0)
}
  0x78   : > { %2660 = dma.hbm_to_vmem [thread:$0]  (!%p3396_p8), %s3388_s4, 16, %s3390_s11, %s3274_s25  }
  0x79   : > { %p3740_p6 = scmp.ne.s32.totalorder %s3731_s26, 0 }
  0x7a   : > { %p3741_p5 = scmp.eq.s32.totalorder (!%p3740_p6), %s3303_s23, 0 }
  0x7b   : > { %204 = sbr.rel (%p3740_p6) target bundleno = 568 (0x238), region = 32 }
  0x82   : > { %3085 = dma.done.wait (%p3741_p5), [#allocation3], 640   ;;  %p3742_p2 = pmov %p3741_p5 }
  0x83   : > { %s210_s29 = sand.u32 1, %s3303_s23   ;;  %s212_s6 = sand.u32 1, %s3118_s16  }
  0x84   : > { %3087 = vsyncadd (%p3742_p2), [#allocation3], 4294966656  ;;  %s2639_s27 = smul.u32 1280, %s212_s6  ;;  %s211_s5 = scalar_lea.sflag [#allocation6], %s210_s29 }
  0x85   : > { %p3743_p9 = scmp.ne.s32.totalorder %s3728_s19, 0 }
  0x86   : > { %s3434_s28 = scalar_lea.vmem [#allocation5], %s2639_s27 }
  0x87   : > { %3089 = dma.done.wait (%p3743_p9), %s211_s5, 20480  }
  0x88   : > { %3091 = vsyncadd (%p3743_p9), %s211_s5, 4294946816  ;;  %s3441_s25 = sand.u32 1, %s3106_s13   ;;  %p3744_p8 = scmp.ne.s32.totalorder %s3729_s15, 0 }
  0x89   : > { %s222_s26 = scalar_lea.vmem [#allocation7], %s3441_s25 }
  0x8a   : > { %3093 = dma.done.wait (%p3744_p8), %s211_s5, 16  }
  0x8b   : > { %3095 = vsyncadd (%p3744_p8), %s211_s5, 4294967280  ;;  %s2247_s23 = sshll.u32 %s3441_s25, 1  ;;  %v2762_v0 = vld [vmem:[%s3434_s28 + $0x40] sm:$0xff]   ;;  %v2766_v4 = vld [vmem:[%s3434_s28 + $0x48] sm:$0xff]   ;;  %v3150_v22 = vmov 1966171168   ;;  %v585_v24 = vlaneseq }
  0x8c   : > { %v2763_v1 = vld [vmem:[%s3434_s28 + $0xc0] sm:$0xff]   ;;  %2418 = vmatprep.subr.bf16.mxu0 %v2762_v0  ;;  %v2767_v5 = vld [vmem:[%s3434_s28 + $0xc8] sm:$0xff]   ;;  %v2770_v8 = vld [vmem:[%s3434_s28 + $0x50] sm:$0xff]   ;;  %v583_v23 = vunpack.c.l.s4 %v3150_v22  ;;  %s251_s19 = smul.u32 2560, %s3126_s18  ;;  %s248_s11 = scalar_lea.vmem [#allocation8], %s2247_s23 }
  0x8d   : > { %v2764_v2 = vld [vmem:[%s3434_s28] sm:$0xff]   ;;  %2440 = vmatprep.subr.bf16.mxu1 %v2763_v1  ;;  %v2768_v6 = vld [vmem:[%s3434_s28 + $0x8] sm:$0xff]   ;;  %v2771_v9 = vld [vmem:[%s3434_s28 + $0xd0] sm:$0xff]   ;;  %v586_v30 = vshrl.u32 %v585_v24, 7  ;;  %p2409_p1 = scmp.ne.s32.totalorder %s3126_s18, 0 }
  0x8e   : > { %v2765_v3 = vld [vmem:[%s3434_s28 + $0x80] sm:$0xff]   ;;  %2419 = vmatpush3.bf16.msra.mxu0 %v2764_v2  ;;  %v2769_v7 = vld [vmem:[%s3434_s28 + $0x88] sm:$0xff]   ;;  %v2772_v10 = vld [vmem:[%s3434_s28 + $0x10] sm:$0xff]   ;;  %v584_v29 = vunpack.c.0.s8 %v583_v23  ;;  %s252_s15 = sshra.s32 %s251_s19, 7 }
  0x8f   : > { %2441 = vmatpush3.bf16.msra.mxu1 %v2765_v3  ;;  %2420 = vmatprep.subr.bf16.mxu0 %v2766_v4  ;;  %v2773_v11 = vld [vmem:[%s3434_s28 + $0x90] sm:$0xff]   ;;  %v2774_v12 = vld [vmem:[%s3434_s28 + $0x58] sm:$0xff]   ;;  %v2778_v16 = vld [vmem:[%s3434_s28 + $0x60] sm:$0xff]   ;;  %s3484_s4 = scalar_lea.vmem [#allocation2], %s252_s15 }
  0x90   : > { %2442 = vmatprep.subr.bf16.mxu1 %v2767_v5  ;;  %v2775_v13 = vld [vmem:[%s3434_s28 + $0xd8] sm:$0xff]   ;;  %v2779_v17 = vld [vmem:[%s3434_s28 + $0xe0] sm:$0xff]   ;;  %v2782_v20 = vld [vmem:[%s3434_s28 + $0x68] sm:$0xff]   ;;  %v3480_v35 = vsub.s32 %v584_v29, %v586_v30 }
  0x91   : > { %v2776_v14 = vld [vmem:[%s3434_s28 + $0x18] sm:$0xff]   ;;  %v2780_v18 = vld [vmem:[%s3434_s28 + $0x20] sm:$0xff]   ;;  %v2783_v21 = vld [vmem:[%s3434_s28 + $0xe8] sm:$0xff]  }
  0x92   : > { %2421 = vmatpush3.bf16.msra.mxu0 %v2768_v6  ;;  %v2777_v15 = vld [vmem:[%s3434_s28 + $0x98] sm:$0xff]   ;;  %v2781_v19 = vld [vmem:[%s3434_s28 + $0xa0] sm:$0xff]   ;;  %v2784_v25 = vld [vmem:[%s3434_s28 + $0x28] sm:$0xff]  }
  0x93   : > { %2443 = vmatpush3.bf16.msra.mxu1 %v2769_v7  ;;  %2422 = vmatprep.subr.bf16.mxu0 %v2770_v8  ;;  %v2785_v26 = vld [vmem:[%s3434_s28 + $0xa8] sm:$0xff]   ;;  %v2786_v27 = vld [vmem:[%s3434_s28 + $0x70] sm:$0xff]   ;;  %v2790_v33 = vld [vmem:[%s3434_s28 + $0x78] sm:$0xff]  }
  0x94   : > { %2444 = vmatprep.subr.bf16.mxu1 %v2771_v9  ;;  %v2787_v28 = vld [vmem:[%s3434_s28 + $0xf0] sm:$0xff]   ;;  %v2791_v34 = vld [vmem:[%s3434_s28 + $0xf8] sm:$0xff]   ;;  %v2795_v41 = vld [vmem:[%s3434_s28 + $0x140] sm:$0xff]  }
  0x95   : > { %v2788_v31 = vld [vmem:[%s3434_s28 + $0x30] sm:$0xff]   ;;  %v2792_v36 = vld [vmem:[%s3434_s28 + $0x38] sm:$0xff]   ;;  %v2796_v42 = vld [vmem:[%s3434_s28 + $0x1c0] sm:$0xff]  }
  0x96   : > { %2423 = vmatpush3.bf16.msra.mxu0 %v2772_v10  ;;  %v2789_v32 = vld [vmem:[%s3434_s28 + $0xb0] sm:$0xff]   ;;  %v2793_v37 = vld [vmem:[%s3434_s28 + $0xb8] sm:$0xff]   ;;  %v2797_v47 = vld [vmem:[%s3434_s28 + $0x100] sm:$0xff]  }
  0x97   : > { %2445 = vmatpush3.bf16.msra.mxu1 %v2773_v11  ;;  %2424 = vmatprep.subr.bf16.mxu0 %v2774_v12  ;;  %v255_v38 = vld [vmem:[%s3484_s4] sm:$0xff]  ;;  %v2799_v50 = vld [vmem:[%s3434_s28 + $0x148] sm:$0xff]   ;;  %v2798_v52 = vld [vmem:[%s3434_s28 + $0x180] sm:$0xff]  }
  0x98   : > { %2446 = vmatprep.subr.bf16.mxu1 %v2775_v13  ;;  %v581_v39 = vcombine.high %v255_v38, %v255_v38  ;;  %v588_v40 = vrot.slane %v255_v38, %v3480_v35  ;;  %v2800_v54 = vld [vmem:[%s3434_s28 + $0x1c8] sm:$0xff]   ;;  %v2803_v57 = vld [vmem:[%s3434_s28 + $0x150] sm:$0xff]   ;;  %v2807_v61 = vld [vmem:[%s3434_s28 + $0x158] sm:$0xff]  }
  0x99   : > { %v2801_v55 = vld [vmem:[%s3434_s28 + $0x108] sm:$0xff]   ;;  %v2804_v59 = vld [vmem:[%s3434_s28 + $0x1d0] sm:$0xff]   ;;  %v2808_v63 = vld [vmem:[%s3434_s28 + $0x1d8] sm:$0xff]  }
  0x9a   : > { %2425 = vmatpush3.bf16.msra.mxu0 %v2776_v14  ;;  %v596_v43 = vcombine.high %v588_v40, %v588_v40  ;;  %v604_v44 = vrot.slane %v588_v40, %v3480_v35  ;;  %v3492_v45 = vrot.slane %v581_v39, %v3480_v35  ;;  %v2802_v58 = vld [vmem:[%s3434_s28 + $0x188] sm:$0xff]   ;;  %v2805_v60 = vld [vmem:[%s3434_s28 + $0x110] sm:$0xff]   ;;  %v2809_v0 = vld [vmem:[%s3434_s28 + $0x118] sm:$0xff]  }
  0x9b   : > { %2447 = vmatpush3.bf16.msra.mxu1 %v2777_v15  ;;  %2426 = vmatprep.subr.bf16.mxu0 %v2778_v16  ;;  %v2806_v62 = vld [vmem:[%s3434_s28 + $0x190] sm:$0xff]   ;;  %v2811_v1 = vld [vmem:[%s3434_s28 + $0x160] sm:$0xff]   ;;  %v2810_v2 = vld [vmem:[%s3434_s28 + $0x198] sm:$0xff]  }
  0x9c   : > { %2448 = vmatprep.subr.bf16.mxu1 %v2779_v17  ;;  %v618_v46 = vrot.slane %v596_v43, %v3480_v35  ;;  %v597_v48 = vcombine.high %v3492_v45, %v3492_v45  ;;  %v626_v49 = vcombine.high %v604_v44, %v604_v44  ;;  %v2812_v3 = vld [vmem:[%s3434_s28 + $0x1e0] sm:$0xff]   ;;  %v2815_v5 = vld [vmem:[%s3434_s28 + $0x168] sm:$0xff]   ;;  %v2819_v9 = vld [vmem:[%s3434_s28 + $0x170] sm:$0xff]   ;;  %v611_v17 = vrot.slane %v3492_v45, %v3480_v35 }
  0x9d   : > { %v2813_v4 = vld [vmem:[%s3434_s28 + $0x120] sm:$0xff]   ;;  %v2816_v7 = vld [vmem:[%s3434_s28 + $0x1e8] sm:$0xff]   ;;  %v2820_v11 = vld [vmem:[%s3434_s28 + $0x1f0] sm:$0xff]  }
  0x9e   : > { %2427 = vmatpush3.bf16.msra.mxu0 %v2780_v18  ;;  %1715 = vmatprep.mubr.bf16.mxu0 %v618_v46  ;;  %v628_v51 = vcombine.high %v618_v46, %v618_v46  ;;  %v625_v53 = vrot.slane %v597_v48, %v3480_v35  ;;  %v2814_v6 = vld [vmem:[%s3434_s28 + $0x1a0] sm:$0xff]   ;;  %v2817_v8 = vld [vmem:[%s3434_s28 + $0x128] sm:$0xff]   ;;  %v2821_v12 = vld [vmem:[%s3434_s28 + $0x130] sm:$0xff]   ;;  %v627_v22 = vcombine.high %v611_v17, %v611_v17 }
  0x9f   : > { %2449 = vmatpush3.bf16.msra.mxu1 %v2781_v19  ;;  %2428 = vmatprep.subr.bf16.mxu0 %v2782_v20  ;;  %v2818_v10 = vld [vmem:[%s3434_s28 + $0x1a8] sm:$0xff]   ;;  %v2823_v13 = vld [vmem:[%s3434_s28 + $0x178] sm:$0xff]   ;;  %v2822_v14 = vld [vmem:[%s3434_s28 + $0x1b0] sm:$0xff]  }
  0xa0   : > { %2450 = vmatprep.subr.bf16.mxu1 %v2783_v21  ;;  %1755 = vmatprep.mubr.bf16.mxu1 %v628_v51  ;;  %v629_v56 = vcombine.high %v625_v53, %v625_v53  ;;  %v2824_v15 = vld [vmem:[%s3434_s28 + $0x1f8] sm:$0xff]   ;;  %v2827_v18 = vld [vmem:[%s3434_s28 + $0x240] sm:$0xff]   ;;  %v2831_v23 = vld [vmem:[%s3434_s28 + $0x248] sm:$0xff]  }
  0xa1   : > { %v2825_v16 = vld [vmem:[%s3434_s28 + $0x138] sm:$0xff]   ;;  %v2828_v20 = vld [vmem:[%s3434_s28 + $0x2c0] sm:$0xff]   ;;  %v2836_v29 = vld [vmem:[%s3434_s28 + $0x2d0] sm:$0xff]  }
  0xa2   : > { %2429 = vmatpush3.bf16.msra.mxu0 %v2784_v25  ;;  %v2826_v19 = vld [vmem:[%s3434_s28 + $0x1b8] sm:$0xff]   ;;  %v2829_v21 = vld [vmem:[%s3434_s28 + $0x200] sm:$0xff]   ;;  %v2832_v25 = vld [vmem:[%s3434_s28 + $0x2c8] sm:$0xff]  }
  0xa3   : > { %2451 = vmatpush3.bf16.msra.mxu1 %v2785_v26  ;;  %2430 = vmatprep.subr.bf16.mxu0 %v2786_v27  ;;  %v2830_v24 = vld [vmem:[%s3434_s28 + $0x280] sm:$0xff]   ;;  %v2833_v26 = vld [vmem:[%s3434_s28 + $0x208] sm:$0xff]   ;;  %v2835_v27 = vld [vmem:[%s3434_s28 + $0x250] sm:$0xff]  }
  0xa4   : > { %2452 = vmatprep.subr.bf16.mxu1 %v2787_v28  ;;  %v2834_v28 = vld [vmem:[%s3434_s28 + $0x288] sm:$0xff]   ;;  %v2837_v30 = vld [vmem:[%s3434_s28 + $0x210] sm:$0xff]   ;;  %v2844_v38 = vld [vmem:[%s3434_s28 + $0x2e0] sm:$0xff]  }
  0xa5   : > { %v2845_v39 = vld [vmem:[%s3434_s28 + $0x220] sm:$0xff]   ;;  %v2847_v40 = vld [vmem:[%s3434_s28 + $0x268] sm:$0xff]   ;;  %v2852_v46 = vld [vmem:[%s3434_s28 + $0x2f0] sm:$0xff]  }
  0xa6   : > { %2431 = vmatpush3.bf16.msra.mxu0 %v2788_v31  ;;  %v2839_v31 = vld [vmem:[%s3434_s28 + $0x258] sm:$0xff]   ;;  %v2849_v43 = vld [vmem:[%s3434_s28 + $0x228] sm:$0xff]   ;;  %v256_v51 = vld [vmem:[%s3484_s4 + $0x8] sm:$0xff] }
  0xa7   : > { %2453 = vmatpush3.bf16.msra.mxu1 %v2789_v32  ;;  %2432 = vmatprep.subr.bf16.mxu0 %v2790_v33  ;;  %v2838_v32 = vld [vmem:[%s3434_s28 + $0x290] sm:$0xff]   ;;  %v2840_v33 = vld [vmem:[%s3434_s28 + $0x2d8] sm:$0xff]   ;;  %v2850_v45 = vld [vmem:[%s3434_s28 + $0x2a8] sm:$0xff]  }
  0xa8   : > { %2454 = vmatprep.subr.bf16.mxu1 %v2791_v34  ;;  %v2841_v34 = vld [vmem:[%s3434_s28 + $0x218] sm:$0xff]  }
  0xa9   : > { %v2855_v48 = vld [vmem:[%s3434_s28 + $0x278] sm:$0xff]  }
  0xaa   : > { %2433 = vmatpush3.bf16.msra.mxu0 %v2792_v36  ;;  %v2843_v36 = vld [vmem:[%s3434_s28 + $0x260] sm:$0xff]  }
  0xab   : > { %2455 = vmatpush3.bf16.msra.mxu1 %v2793_v37  ;;  %2462 = vmatprep.subr.bf16.mxu0 %v2795_v41  ;;  %v2842_v37 = vld [vmem:[%s3434_s28 + $0x298] sm:$0xff]   ;;  %v2846_v41 = vld [vmem:[%s3434_s28 + $0x2a0] sm:$0xff]  }
  0xac   : > { %2484 = vmatprep.subr.bf16.mxu1 %v2796_v42  ;;  %v2848_v42 = vld [vmem:[%s3434_s28 + $0x2e8] sm:$0xff]  }
  0xad   : > { %1716 = vmatmul.mubr.bf16.vlgmr.msra.gmra.mrb[0].mxu0 %v604_v44  ;;  %v2851_v44 = vld [vmem:[%s3434_s28 + $0x270] sm:$0xff]  }
  0xae   : > { %2463 = vmatpush3.bf16.msra.mxu0 %v2797_v47  ;;  %1756 = vmatmul.mubr.bf16.vlgmr.msra.gmra.mrb[0].mxu1 %v626_v49  ;;  %v2853_v47 = vld [vmem:[%s3434_s28 + $0x230] sm:$0xff]  }
  0xaf   : > { %2464 = vmatprep.subr.bf16.mxu0 %v2799_v50  ;;  %2485 = vmatpush3.bf16.msra.mxu1 %v2798_v52  ;;  %v2854_v49 = vld [vmem:[%s3434_s28 + $0x2b0] sm:$0xff]   ;;  %v2856_v50 = vld [vmem:[%s3434_s28 + $0x2f8] sm:$0xff]  }
  0xb0   : > { %1795 = vmatprep.mubr.bf16.mxu0 %v625_v53  ;;  %2486 = vmatprep.subr.bf16.mxu1 %v2800_v54  ;;  %v2857_v52 = vld [vmem:[%s3434_s28 + $0x238] sm:$0xff]   ;;  %v637_v53 = vrot.slane %v256_v51, %v3480_v35  ;;  %v630_v54 = vcombine.high %v256_v51, %v256_v51  ;;  %v2908_v51 = vld [vmem:[%s3434_s28 + $0x460] sm:$0xff]  }
  0xb1   : > { %1835 = vmatprep.mubr.bf16.mxu1 %v629_v56  ;;  %v2858_v56 = vld [vmem:[%s3434_s28 + $0x2b8] sm:$0xff]  }
  0xb2   : > { %2465 = vmatpush3.bf16.msra.mxu0 %v2801_v55  ;;  %v2859_v55 = vld [vmem:[%s3434_s28 + $0x340] sm:$0xff]  }
  0xb3   : > { %2466 = vmatprep.subr.bf16.mxu0 %v2803_v57  ;;  %2487 = vmatpush3.bf16.msra.mxu1 %v2802_v58  ;;  %v645_v57 = vcombine.high %v637_v53, %v637_v53  ;;  %v653_v58 = vrot.slane %v637_v53, %v3480_v35  ;;  %v2909_v53 = vld [vmem:[%s3434_s28 + $0x4e0] sm:$0xff]  }
  0xb4   : > { %2488 = vmatprep.subr.bf16.mxu1 %v2804_v59  ;;  %v3567_v59 = vrot.slane %v630_v54, %v3480_v35  ;;  %v2910_v54 = vld [vmem:[%s3434_s28 + $0x420] sm:$0xff]  }
  0xb6   : > { %2467 = vmatpush3.bf16.msra.mxu0 %v2805_v60  ;;  %v2860_v60 = vld [vmem:[%s3434_s28 + $0x3c0] sm:$0xff]  }
  0xb7   : > { %2468 = vmatprep.subr.bf16.mxu0 %v2807_v61  ;;  %2489 = vmatpush3.bf16.msra.mxu1 %v2806_v62  ;;  %v667_v61 = vrot.slane %v645_v57, %v3480_v35  ;;  %v2861_v62 = vld [vmem:[%s3434_s28 + $0x300] sm:$0xff]   ;;  %v2913_v57 = vld [vmem:[%s3434_s28 + $0x4e8] sm:$0xff]  }
  0xb8   : > { %2490 = vmatprep.subr.bf16.mxu1 %v2808_v63  ;;  %v646_v63 = vcombine.high %v3567_v59, %v3567_v59 }
  0xba   : > { %2469 = vmatpush3.bf16.msra.mxu0 %v2809_v0  ;;  %v675_v0 = vcombine.high %v653_v58, %v653_v58 }
  0xbb   : > { %2470 = vmatprep.subr.bf16.mxu0 %v2811_v1  ;;  %2491 = vmatpush3.bf16.msra.mxu1 %v2810_v2  ;;  %v2863_v1 = vld [vmem:[%s3434_s28 + $0x348] sm:$0xff]   ;;  %v677_v2 = vcombine.high %v667_v61, %v667_v61 }
  0xbc   : > { %2492 = vmatprep.subr.bf16.mxu1 %v2812_v3  ;;  %v2862_v3 = vld [vmem:[%s3434_s28 + $0x380] sm:$0xff]  }
  0xbe   : > { %2471 = vmatpush3.bf16.msra.mxu0 %v2813_v4  ;;  %v674_v4 = vrot.slane %v646_v63, %v3480_v35  ;;  %v2920_v63 = vld [vmem:[%s3434_s28 + $0x478] sm:$0xff]  }
  0xbf   : > { %2472 = vmatprep.subr.bf16.mxu0 %v2815_v5  ;;  %2493 = vmatpush3.bf16.msra.mxu1 %v2814_v6  ;;  %v2864_v5 = vld [vmem:[%s3434_s28 + $0x3c8] sm:$0xff]  }
  0xc0   : > { %2494 = vmatprep.subr.bf16.mxu1 %v2816_v7  ;;  %v2865_v6 = vld [vmem:[%s3434_s28 + $0x308] sm:$0xff]   ;;  %v678_v7 = vcombine.high %v674_v4, %v674_v4 }
  0xc2   : > { %2473 = vmatpush3.bf16.msra.mxu0 %v2817_v8  ;;  %v2867_v8 = vld [vmem:[%s3434_s28 + $0x350] sm:$0xff]  }
  0xc3   : > { %2474 = vmatprep.subr.bf16.mxu0 %v2819_v9  ;;  %2495 = vmatpush3.bf16.msra.mxu1 %v2818_v10  ;;  %v2866_v9 = vld [vmem:[%s3434_s28 + $0x388] sm:$0xff]   ;;  %v2868_v10 = vld [vmem:[%s3434_s28 + $0x3d0] sm:$0xff]  }
  0xc4   : > { %2496 = vmatprep.subr.bf16.mxu1 %v2820_v11  ;;  %v2869_v11 = vld [vmem:[%s3434_s28 + $0x310] sm:$0xff]  }
  0xc6   : > { %2475 = vmatpush3.bf16.msra.mxu0 %v2821_v12  ;;  %v2871_v12 = vld [vmem:[%s3434_s28 + $0x358] sm:$0xff]  }
  0xc7   : > { %2476 = vmatprep.subr.bf16.mxu0 %v2823_v13  ;;  %2497 = vmatpush3.bf16.msra.mxu1 %v2822_v14  ;;  %v2870_v13 = vld [vmem:[%s3434_s28 + $0x390] sm:$0xff]   ;;  %v2872_v14 = vld [vmem:[%s3434_s28 + $0x3d8] sm:$0xff]  }
  0xc8   : > { %2498 = vmatprep.subr.bf16.mxu1 %v2824_v15  ;;  %v2873_v15 = vld [vmem:[%s3434_s28 + $0x318] sm:$0xff]  }
  0xca   : > { %2477 = vmatpush3.bf16.msra.mxu0 %v2825_v16  ;;  %v2875_v16 = vld [vmem:[%s3434_s28 + $0x360] sm:$0xff]  }
  0xcb   : > { %2506 = vmatprep.subr.bf16.mxu0 %v2827_v18  ;;  %2499 = vmatpush3.bf16.msra.mxu1 %v2826_v19  ;;  %v2876_v18 = vld [vmem:[%s3434_s28 + $0x3e0] sm:$0xff]  }
  0xcc   : > { %2528 = vmatprep.subr.bf16.mxu1 %v2828_v20  ;;  %v2877_v19 = vld [vmem:[%s3434_s28 + $0x320] sm:$0xff]   ;;  %v2879_v20 = vld [vmem:[%s3434_s28 + $0x368] sm:$0xff]  }
  0xcd   : > { %1796 = vmatmul.mubr.bf16.vlgmr.msra.gmra.mrb[4].mxu0 %v611_v17  ;;  %v2874_v17 = vld [vmem:[%s3434_s28 + $0x398] sm:$0xff]  }
  0xce   : > { %2507 = vmatpush3.bf16.msra.mxu0 %v2829_v21  ;;  %1836 = vmatmul.mubr.bf16.vlgmr.msra.gmra.mrb[4].mxu1 %v627_v22  ;;  %v2878_v21 = vld [vmem:[%s3434_s28 + $0x3a0] sm:$0xff]   ;;  %v2880_v22 = vld [vmem:[%s3434_s28 + $0x3e8] sm:$0xff]  }
  0xcf   : > { %2508 = vmatprep.subr.bf16.mxu0 %v2831_v23  ;;  %2529 = vmatpush3.bf16.msra.mxu1 %v2830_v24  ;;  %v2881_v23 = vld [vmem:[%s3434_s28 + $0x328] sm:$0xff]   ;;  %v2883_v24 = vld [vmem:[%s3434_s28 + $0x370] sm:$0xff]  }
  0xd0   : > { %2530 = vmatprep.subr.bf16.mxu1 %v2832_v25  ;;  %1875 = vmatprep.mubr.bf16.mxu0 %v667_v61  ;;  %v2882_v25 = vld [vmem:[%s3434_s28 + $0x3a8] sm:$0xff]   ;;  %v2917_v61 = vld [vmem:[%s3434_s28 + $0x4f0] sm:$0xff]  }
  0xd1   : > { %1915 = vmatprep.mubr.bf16.mxu1 %v677_v2  ;;  %v2922_v2 = vld [vmem:[%s3434_s28 + $0x438] sm:$0xff]  }
  0xd2   : > { %2509 = vmatpush3.bf16.msra.mxu0 %v2833_v26  ;;  %v2884_v26 = vld [vmem:[%s3434_s28 + $0x3f0] sm:$0xff]  }
  0xd3   : > { %2510 = vmatprep.subr.bf16.mxu0 %v2835_v27  ;;  %2531 = vmatpush3.bf16.msra.mxu1 %v2834_v28  ;;  %v2885_v27 = vld [vmem:[%s3434_s28 + $0x330] sm:$0xff]   ;;  %v2887_v28 = vld [vmem:[%s3434_s28 + $0x378] sm:$0xff]  }
  0xd4   : > { %2532 = vmatprep.subr.bf16.mxu1 %v2836_v29  ;;  %v2886_v29 = vld [vmem:[%s3434_s28 + $0x3b0] sm:$0xff]  }
  0xd6   : > { %2511 = vmatpush3.bf16.msra.mxu0 %v2837_v30  ;;  %v2888_v30 = vld [vmem:[%s3434_s28 + $0x3f8] sm:$0xff]  }
  0xd7   : > { %2512 = vmatprep.subr.bf16.mxu0 %v2839_v31  ;;  %2533 = vmatpush3.bf16.msra.mxu1 %v2838_v32  ;;  %v2889_v31 = vld [vmem:[%s3434_s28 + $0x338] sm:$0xff]   ;;  %v660_v32 = vrot.slane %v3567_v59, %v3480_v35  ;;  %v2916_v59 = vld [vmem:[%s3434_s28 + $0x470] sm:$0xff]  }
  0xd8   : > { %2534 = vmatprep.subr.bf16.mxu1 %v2840_v33  ;;  %v2892_v33 = vld [vmem:[%s3434_s28 + $0x440] sm:$0xff]  }
  0xda   : > { %2513 = vmatpush3.bf16.msra.mxu0 %v2841_v34  ;;  %v2890_v34 = vld [vmem:[%s3434_s28 + $0x3b8] sm:$0xff]  }
  0xdb   : > { %2514 = vmatprep.subr.bf16.mxu0 %v2843_v36  ;;  %2535 = vmatpush3.bf16.msra.mxu1 %v2842_v37  ;;  %v2893_v36 = vld [vmem:[%s3434_s28 + $0x4c0] sm:$0xff]  }
  0xdc   : > { %2536 = vmatprep.subr.bf16.mxu1 %v2844_v38  ;;  %v2894_v37 = vld [vmem:[%s3434_s28 + $0x400] sm:$0xff]   ;;  %v676_v38 = vcombine.high %v660_v32, %v660_v32 }
  0xde   : > { %2515 = vmatpush3.bf16.msra.mxu0 %v2845_v39  ;;  %v2896_v39 = vld [vmem:[%s3434_s28 + $0x448] sm:$0xff]  }
  0xdf   : > { %2516 = vmatprep.subr.bf16.mxu0 %v2847_v40  ;;  %2537 = vmatpush3.bf16.msra.mxu1 %v2846_v41  ;;  %v2895_v40 = vld [vmem:[%s3434_s28 + $0x480] sm:$0xff]   ;;  %v2897_v41 = vld [vmem:[%s3434_s28 + $0x4c8] sm:$0xff]  }
  0xe0   : > { %2538 = vmatprep.subr.bf16.mxu1 %v2848_v42  ;;  %v2898_v42 = vld [vmem:[%s3434_s28 + $0x408] sm:$0xff]  }
  0xe2   : > { %2517 = vmatpush3.bf16.msra.mxu0 %v2849_v43  ;;  %v2900_v43 = vld [vmem:[%s3434_s28 + $0x450] sm:$0xff]  }
  0xe3   : > { %2518 = vmatprep.subr.bf16.mxu0 %v2851_v44  ;;  %2539 = vmatpush3.bf16.msra.mxu1 %v2850_v45  ;;  %v2899_v44 = vld [vmem:[%s3434_s28 + $0x488] sm:$0xff]   ;;  %v2901_v45 = vld [vmem:[%s3434_s28 + $0x4d0] sm:$0xff]  }
  0xe4   : > { %2540 = vmatprep.subr.bf16.mxu1 %v2852_v46  ;;  %v2902_v46 = vld [vmem:[%s3434_s28 + $0x410] sm:$0xff]  }
  0xe6   : > { %2519 = vmatpush3.bf16.msra.mxu0 %v2853_v47  ;;  %v2904_v47 = vld [vmem:[%s3434_s28 + $0x458] sm:$0xff]  }
  0xe7   : > { %2520 = vmatprep.subr.bf16.mxu0 %v2855_v48  ;;  %2541 = vmatpush3.bf16.msra.mxu1 %v2854_v49  ;;  %v2903_v48 = vld [vmem:[%s3434_s28 + $0x490] sm:$0xff]   ;;  %v2905_v49 = vld [vmem:[%s3434_s28 + $0x4d8] sm:$0xff]  }
  0xe8   : > { %2542 = vmatprep.subr.bf16.mxu1 %v2856_v50  ;;  %v2906_v50 = vld [vmem:[%s3434_s28 + $0x418] sm:$0xff]  }
  0xea   : > { %2521 = vmatpush3.bf16.msra.mxu0 %v2857_v52  ;;  %v2907_v52 = vld [vmem:[%s3434_s28 + $0x498] sm:$0xff]  }
  0xeb   : > { %2550 = vmatprep.subr.bf16.mxu0 %v2859_v55  ;;  %2543 = vmatpush3.bf16.msra.mxu1 %v2858_v56  ;;  %v2912_v55 = vld [vmem:[%s3434_s28 + $0x468] sm:$0xff]   ;;  %v2911_v56 = vld [vmem:[%s3434_s28 + $0x4a0] sm:$0xff]  }
  0xec   : > { %2572 = vmatprep.subr.bf16.mxu1 %v2860_v60  ;;  %v2915_v60 = vld [vmem:[%s3434_s28 + $0x4a8] sm:$0xff]  }
  0xed   : > { %1876 = vmatmul.mubr.bf16.vlgmr.msra.gmra.mrb[8].mxu0 %v653_v58  ;;  %v2914_v58 = vld [vmem:[%s3434_s28 + $0x428] sm:$0xff]  }
  0xee   : > { %2551 = vmatpush3.bf16.msra.mxu0 %v2861_v62  ;;  %1916 = vmatmul.mubr.bf16.vlgmr.msra.gmra.mrb[8].mxu1 %v675_v0  ;;  %v2918_v62 = vld [vmem:[%s3434_s28 + $0x430] sm:$0xff]  }
  0xef   : > { %2552 = vmatprep.subr.bf16.mxu0 %v2863_v1  ;;  %2573 = vmatpush3.bf16.msra.mxu1 %v2862_v3  ;;  %v2919_v0 = vld [vmem:[%s3434_s28 + $0x4b0] sm:$0xff]   ;;  %v2921_v1 = vld [vmem:[%s3434_s28 + $0x4f8] sm:$0xff]   ;;  %v2248_v3 = vld.sshfl [vmem:[%s3484_s4 + $0x10] sm:$0x33 pattern:$0x75316420] }
  0xf0   : > { %1955 = vmatprep.mubr.bf16.mxu0 %v674_v4  ;;  %2574 = vmatprep.subr.bf16.mxu1 %v2864_v5  ;;  %v686_v4 = vcombine.high %v2248_v3, %v2248_v3  ;;  %v693_v5 = vrot.slane %v2248_v3, %v3480_v35 }
  0xf1   : > { %1995 = vmatprep.mubr.bf16.mxu1 %v678_v7 }
  0xf2   : > { %2553 = vmatpush3.bf16.msra.mxu0 %v2865_v6  ;;  %v2923_v6 = vld [vmem:[%s3434_s28 + $0x4b8] sm:$0xff]   ;;  %v700_v7 = vrot.slane %v686_v4, %v3480_v35 }
  0xf3   : > { %2554 = vmatprep.subr.bf16.mxu0 %v2867_v8  ;;  %2575 = vmatpush3.bf16.msra.mxu1 %v2866_v9  ;;  %v701_v9 = vcombine.high %v693_v5, %v693_v5 }
  0xf4   : > { %2576 = vmatprep.subr.bf16.mxu1 %v2868_v10  ;;  %v702_v8 = vcombine.high %v700_v7, %v700_v7 }
  0xf6   : > { %2555 = vmatpush3.bf16.msra.mxu0 %v2869_v11 }
  0xf7   : > { %2556 = vmatprep.subr.bf16.mxu0 %v2871_v12  ;;  %2577 = vmatpush3.bf16.msra.mxu1 %v2870_v13 }
  0xf8   : > { %2578 = vmatprep.subr.bf16.mxu1 %v2872_v14 }
  0xfa   : > { %2557 = vmatpush3.bf16.msra.mxu0 %v2873_v15 }
  0xfb   : > { %2558 = vmatprep.subr.bf16.mxu0 %v2875_v16  ;;  %2579 = vmatpush3.bf16.msra.mxu1 %v2874_v17 }
  0xfc   : > { %2580 = vmatprep.subr.bf16.mxu1 %v2876_v18 }
  0xfe   : > { %2559 = vmatpush3.bf16.msra.mxu0 %v2877_v19 }
  0xff   : > { %2560 = vmatprep.subr.bf16.mxu0 %v2879_v20  ;;  %2581 = vmatpush3.bf16.msra.mxu1 %v2878_v21 }
 0x100   : > { %2582 = vmatprep.subr.bf16.mxu1 %v2880_v22 }
 0x102   : > { %2561 = vmatpush3.bf16.msra.mxu0 %v2881_v23 }
 0x103   : > { %2562 = vmatprep.subr.bf16.mxu0 %v2883_v24  ;;  %2583 = vmatpush3.bf16.msra.mxu1 %v2882_v25 }
 0x104   : > { %2584 = vmatprep.subr.bf16.mxu1 %v2884_v26 }
 0x106   : > { %2563 = vmatpush3.bf16.msra.mxu0 %v2885_v27 }
 0x107   : > { %2564 = vmatprep.subr.bf16.mxu0 %v2887_v28  ;;  %2585 = vmatpush3.bf16.msra.mxu1 %v2886_v29 }
 0x108   : > { %2586 = vmatprep.subr.bf16.mxu1 %v2888_v30 }
 0x10a   : > { %2565 = vmatpush3.bf16.msra.mxu0 %v2889_v31 }
 0x10b   : > { %2594 = vmatprep.subr.bf16.mxu0 %v2892_v33  ;;  %2587 = vmatpush3.bf16.msra.mxu1 %v2890_v34 }
 0x10c   : > { %2616 = vmatprep.subr.bf16.mxu1 %v2893_v36 }
 0x10d   : > { %1956 = vmatmul.mubr.bf16.vlgmr.msra.gmra.mrb[12].mxu0 %v660_v32 }
 0x10e   : > { %2595 = vmatpush3.bf16.msra.mxu0 %v2894_v37  ;;  %1996 = vmatmul.mubr.bf16.vlgmr.msra.gmra.mrb[12].mxu1 %v676_v38 }
 0x10f   : > { %2596 = vmatprep.subr.bf16.mxu0 %v2896_v39  ;;  %2617 = vmatpush3.bf16.msra.mxu1 %v2895_v40 }
 0x110   : > { %2618 = vmatprep.subr.bf16.mxu1 %v2897_v41  ;;  %2035 = vmatprep.mubr.bf16.mxu0 %v700_v7 }
 0x111   : > { %2075 = vmatprep.mubr.bf16.mxu1 %v702_v8 }
 0x112   : > { %2597 = vmatpush3.bf16.msra.mxu0 %v2898_v42 }
 0x113   : > { %2598 = vmatprep.subr.bf16.mxu0 %v2900_v43  ;;  %2619 = vmatpush3.bf16.msra.mxu1 %v2899_v44 }
 0x114   : > { %2620 = vmatprep.subr.bf16.mxu1 %v2901_v45 }
 0x116   : > { %2599 = vmatpush3.bf16.msra.mxu0 %v2902_v46 }
 0x117   : > { %2600 = vmatprep.subr.bf16.mxu0 %v2904_v47  ;;  %2621 = vmatpush3.bf16.msra.mxu1 %v2903_v48 }
 0x118   : > { %2622 = vmatprep.subr.bf16.mxu1 %v2905_v49 }
 0x11a   : > { %2601 = vmatpush3.bf16.msra.mxu0 %v2906_v50 }
 0x11b   : > { %2602 = vmatprep.subr.bf16.mxu0 %v2908_v51  ;;  %2623 = vmatpush3.bf16.msra.mxu1 %v2907_v52 }
 0x11c   : > { %2624 = vmatprep.subr.bf16.mxu1 %v2909_v53 }
 0x11e   : > { %2603 = vmatpush3.bf16.msra.mxu0 %v2910_v54 }
 0x11f   : > { %2604 = vmatprep.subr.bf16.mxu0 %v2912_v55  ;;  %2625 = vmatpush3.bf16.msra.mxu1 %v2911_v56 }
 0x120   : > { %2626 = vmatprep.subr.bf16.mxu1 %v2913_v57 }
 0x122   : > { %2605 = vmatpush3.bf16.msra.mxu0 %v2914_v58 }
 0x123   : > { %2606 = vmatprep.subr.bf16.mxu0 %v2916_v59  ;;  %2627 = vmatpush3.bf16.msra.mxu1 %v2915_v60 }
 0x124   : > { %2628 = vmatprep.subr.bf16.mxu1 %v2917_v61 }
 0x126   : > { %2607 = vmatpush3.bf16.msra.mxu0 %v2918_v62 }
 0x127   : > { %2608 = vmatprep.subr.bf16.mxu0 %v2920_v63  ;;  %2629 = vmatpush3.bf16.msra.mxu1 %v2919_v0 }
 0x128   : > { %2630 = vmatprep.subr.bf16.mxu1 %v2921_v1 }
 0x12a   : > { %2609 = vmatpush3.bf16.msra.mxu0 %v2922_v2 }
 0x12b   : > { %2631 = vmatpush3.bf16.msra.mxu1 %v2923_v6 }
 0x12d   : > { %2036 = vmatmul.mubr.bf16.vlgmr.msra.gmra.mrb[16].mxu0 %v693_v5 }
 0x12e   : > { %2076 = vmatmul.mubr.bf16.vlgmr.msra.gmra.mrb[16].mxu1 %v701_v9 }
 0x180   : > { %v2434_v10 = vpop.f32.mrb[0].mxu0 }
 0x181   : > { %v2435_v11 = vpop.f32.mrb[1].mxu0  ;;  %v2456_v12 = vpop.f32.mrb[0].mxu1 }
 0x182   : > { %v2436_v13 = vadd.f32 %v2435_v11, %v2434_v10  ;;  %v2437_v14 = vpop.f32.mrb[2].mxu0  ;;  %v2457_v15 = vpop.f32.mrb[1].mxu1 }
 0x183   : > { %v2438_v16 = vpop.f32.mrb[3].mxu0  ;;  %v2458_v17 = vadd.f32 %v2457_v15, %v2456_v12  ;;  %v2459_v18 = vpop.f32.mrb[2].mxu1 }
 0x184   : > { %v2460_v19 = vpop.f32.mrb[3].mxu1 }
 0x185   : > { %v1758_v20 = vadd.f32 %v2458_v17, %v2436_v13 }
 0x1a0   : > { %v2478_v35 = vpop.f32.mrb[4].mxu0 }
 0x1a1   : > { %v2479_v21 = vpop.f32.mrb[5].mxu0  ;;  %v2500_v22 = vpop.f32.mrb[4].mxu1 }
 0x1a2   : > { %v2480_v23 = vadd.f32 %v2479_v21, %v2478_v35  ;;  %v2481_v24 = vpop.f32.mrb[6].mxu0  ;;  %v2501_v25 = vpop.f32.mrb[5].mxu1 }
 0x1a3   : > { %v2482_v26 = vpop.f32.mrb[7].mxu0  ;;  %v2502_v28 = vadd.f32 %v2501_v25, %v2500_v22  ;;  %v2503_v29 = vpop.f32.mrb[6].mxu1 }
 0x1a4   : > { %v1798_v27 = vadd.f32 %v2480_v23, %v1758_v20  ;;  %v2504_v30 = vpop.f32.mrb[7].mxu1 }
 0x1a6   : > { %v1838_v31 = vadd.f32 %v2502_v28, %v1798_v27 }
 0x1c0   : > { %v2522_v32 = vpop.f32.mrb[8].mxu0 }
 0x1c1   : > { %v2523_v33 = vpop.f32.mrb[9].mxu0  ;;  %v2544_v34 = vpop.f32.mrb[8].mxu1 }
 0x1c2   : > { %v2524_v36 = vadd.f32 %v2523_v33, %v2522_v32  ;;  %v2525_v37 = vpop.f32.mrb[10].mxu0  ;;  %v2545_v38 = vpop.f32.mrb[9].mxu1 }
 0x1c3   : > { %v2526_v39 = vpop.f32.mrb[11].mxu0  ;;  %v2546_v41 = vadd.f32 %v2545_v38, %v2544_v34  ;;  %v2547_v42 = vpop.f32.mrb[10].mxu1 }
 0x1c4   : > { %v1878_v40 = vadd.f32 %v2524_v36, %v1838_v31  ;;  %v2548_v43 = vpop.f32.mrb[11].mxu1 }
 0x1c6   : > { %v1918_v44 = vadd.f32 %v2546_v41, %v1878_v40 }
 0x1e0   : > { %v2566_v45 = vpop.f32.mrb[12].mxu0 }
 0x1e1   : > { %v2567_v46 = vpop.f32.mrb[13].mxu0  ;;  %v2588_v47 = vpop.f32.mrb[12].mxu1 }
 0x1e2   : > { %v2568_v48 = vadd.f32 %v2567_v46, %v2566_v45  ;;  %v2569_v49 = vpop.f32.mrb[14].mxu0  ;;  %v2589_v50 = vpop.f32.mrb[13].mxu1 }
 0x1e3   : > { %v2570_v51 = vpop.f32.mrb[15].mxu0  ;;  %v2590_v53 = vadd.f32 %v2589_v50, %v2588_v47  ;;  %v2591_v54 = vpop.f32.mrb[14].mxu1 }
 0x1e4   : > { %v1958_v52 = vadd.f32 %v2568_v48, %v1918_v44  ;;  %v2592_v55 = vpop.f32.mrb[15].mxu1 }
 0x1e6   : > { %v1998_v56 = vadd.f32 %v2590_v53, %v1958_v52 }
 0x200   : > { %v2610_v57 = vpop.f32.mrb[16].mxu0  ;;  %2086 = sbr.rel (%p2409_p1) target bundleno = 521 (0x209), region = 48 }
 0x201   : > { %v2611_v58 = vpop.f32.mrb[17].mxu0  ;;  %v2632_v59 = vpop.f32.mrb[16].mxu1 }
 0x202   : > { %v2612_v60 = vadd.f32 %v2611_v58, %v2610_v57  ;;  %v2613_v61 = vpop.f32.mrb[18].mxu0  ;;  %v2633_v62 = vpop.f32.mrb[17].mxu1 }
 0x203   : > { %v2614_v63 = vpop.f32.mrb[19].mxu0  ;;  %v2634_v1 = vadd.f32 %v2633_v62, %v2632_v59  ;;  %v2635_v2 = vpop.f32.mrb[18].mxu1 }
 0x204   : > { %v2038_v0 = vadd.f32 %v2612_v60, %v1998_v56  ;;  %v2636_v3 = vpop.f32.mrb[19].mxu1 }
 0x206   : > { %v2078_v4 = vadd.f32 %v2634_v1, %v2038_v0 }
 0x208   : > { %2087 = vst [vmem:[%s248_s11] sm:$0x3] %v2078_v4 }
 0x209 PF: > { %p2410_p3 = scmp.le.s32.totalorder %s3126_s18, 0 }
 0x20b   : > { %2091 = sbr.rel (%p2410_p3) target bundleno = 531 (0x213), region = 52 }
 0x20f   : > { %v2092_v5 = vld [vmem:[%s248_s11] sm:$0x3] (!%p2410_p3) }
 0x210   : > { %v2093_v6 = vadd.f32 (!%p2410_p3), %v2092_v5, %v2078_v4 }
 0x212   : > { %2094 = vst [vmem:[%s248_s11] sm:$0x3] %v2093_v6 }
 0x213 PF: > { %p2411_p4 = scmp.ne.s32.totalorder %s3126_s18, 1 }
 0x214   : > { %v2412_v8 = vld [vmem:[%s222_s26] ss:$0 sm:$0xff] (!%p2411_p4) }
 0x215   : > { %2098 = sbr.rel (%p2411_p4) target bundleno = 543 (0x21f), region = 56 }
 0x219   : > { %v2099_v7 = vld [vmem:[%s248_s11] sm:$0x3] (!%p2411_p4) }
 0x21a   : > { %v2107_v9 = vadd.f32 (!%p2411_p4), %v2412_v8, %v2099_v7 }
 0x21c   : > { %v2108_v10 = vmax.f32 %v2107_v9, 0.0 }
 0x21e   : > { %2109 = vst [vmem:[%s248_s11] sm:$0x3] %v2108_v10 }
 0x21f PF: > { %s3745_s30 = sld [smem:[#allocation13_spill]]  ;;  %s3746_s6 = sld [smem:[#allocation16_spill]] }
 0x220   : > { %s2124_s5 = sshll.u32 %s248_s11, 4  ;;  %s2111_s18 = scalar_lea.sflag [#allocation4], %s3441_s25  ;;  %s2125_s5 = int_to_ptr.vmem [resolvable:$true] %s2124_s5 }
 0x221   : > { %s3012_s28 = scalar_lea.vmem %s2125_s5, 32  ;;  %s3151_s26 = smov [#allocation8]  }
 0x222   : > { %p3013_p12 = scmp.ne.s32.totalorder %s2125_s5, %s3012_s28  ;;  %s3016_s23 = sshll.u32 %s3151_s26, 4  ;;  %s3017_s23 = int_to_ptr.vmem [resolvable:$false] %s3016_s23 }
 0x223   : > { %s3018_s19 = scalar_lea.vmem %s3017_s23, 64  ;;  %p3019_p13 = scmp.lt.s32.totalorder %s2125_s5, %s3017_s23 }
 0x224   : > { %p3014_p7 = pnand %p3013_p12, %p3379_p11  ;;  %p3020_p0 = scmp.lt.s32.totalorder %s3018_s19, %s3012_s28 }
 0x225   : > { %s2414_s3 = sshll.u32 %s3745_s30, 5 }
 0x226   : > { %s3652_s27 = scalar_lea.hbm %s3746_s6, %s2414_s3  ;;  %p3015_p10 = pneg %p3014_p7 }
 0x227   : > { %p3021_p6 = por %p3020_p0, %p3019_p13 }
 0x229   : > { %p3022_p5 = pnand %p3021_p6, %p3015_p10 }
 0x22b   : > { %3025 = shalt.err (!%p3022_p5)
}
 0x22c   : > { %s3026_s25 = scalar_lea.hbm %s3652_s27, 32  ;;  %s3030_s11 = scalar_lea.hbm %s3746_s6, 64 }
 0x22d   : > { %p3027_p2 = scmp.ne.s32.totalorder %s3652_s27, %s3026_s25  ;;  %p3031_p1 = scmp.lt.u32.totalorder %s3652_s27, %s3746_s6 }
 0x22e   : > { %p3032_p3 = scmp.lt.u32.totalorder %s3030_s11, %s3026_s25  ;;  %p3034_p12 = scmp.lt.u32.totalorder %s3026_s25, %s3652_s27 }
 0x22f   : > { %p3028_p9 = pnand %p3027_p2, %p3379_p11 }
 0x230   : > { %p3033_p4 = por %p3032_p3, %p3031_p1 }
 0x231   : > { %p3029_p8 = pneg %p3028_p9 }
 0x232   : > { %p3035_p7 = por %p3034_p12, %p3033_p4 }
 0x234   : > { %p3036_p10 = pnand %p3035_p7, %p3029_p8 }
 0x236   : > { %3039 = shalt.err (!%p3036_p10)
}
 0x237   : > { %2648 = dma.vmem_to_hbm [thread:$0]  (%p3379_p11), %s2125_s5, 32, %s3652_s27, %s2111_s18  }
 0x238 PF: > { %p2668_p13 = scmp.ge.s32.totalorder %s3142_s22, 2  ;;  %s2136_s8 = sand.u32 1, %s3102_s12  }
 0x239   : > { %p3747_p0 = scmp.ne.s32.totalorder %s3730_s9, 0  ;;  %s2137_s29 = scalar_lea.sflag [#allocation4], %s2136_s8 }
 0x23b   : > { %p2662_p6 = pnand %p2668_p13, %p3747_p0 }
 0x23d   : > { %3097 = dma.done.wait (!%p2662_p6), %s2137_s29, 32  }
 0x23e   : > { %3099 = vsyncadd (!%p2662_p6), %s2137_s29, 4294967264  ;;  %s20_s22 = sadd.s32 1, %s3142_s22   ;;  %s3748_s1 = sld [smem:[#allocation14_spill]] }
 0x23f   : > { %p17_p5 = scmp.ge.s32.totalorder %s20_s22, 6   ;;  %s3749_s12 = smov %s3106_s13 }
 0x240   : > { %s3750_s13 = smov %s3110_s14  ;;  %s3751_s14 = smov %s3347_s7 }
 0x241   : > { %s3752_s15 = smov %s3118_s16  ;;  %s3753_s16 = smov %s3122_s17 }
 0x242   : > { %s3754_s17 = smov %s3257_s10  ;;  %s3755_s18 = smov %s3134_s20 }
 0x243   : > { %s3756_s19 = smov %s3138_s21  ;;  %s3758_s21 = smov %s3764_s24 }
 0x244   : > { %s3757_s20 = smov %s3748_s1  ;;  %19 = sbr.rel (!%p17_p5) target bundleno = 13 (0xd), region = 106 }
 0x24b   :  { %2142 = vsyncpa [#allocation3], 1 }
 0x24c   :  { %2144 = vsyncpa [#allocation3 + $0x1], 1 }
 0x24d   :  { %2145 = vsyncpa [#allocation6], 1 }
 0x24e   :  { %2147 = vsyncpa [#allocation6 + $0x1], 1 }
 0x24f   :  { %2148 = vsyncpa [#allocation4], 1 }
 0x250   :  { %2150 = vsyncpa [#allocation4 + $0x1], 1 }

</bundles_post_ra>
